<compile_context>
chip_gen: v5e
topology: v5e:2x2
jax: 0.10.0
libtpu: 0.0.40
codegen_flags: <defaults>
</compile_context>

<pallas_src>
import functools

import jax
import jax.numpy as jnp
from jax.experimental import pallas as pl
from jax.experimental.pallas import tpu as pltpu


def _improved_bounded_kernel(x_ref, o_ref, *, inv_temperature, scale_factor, vocab):
    f32 = jnp.float32
    eps = 1e-7

    # --- per-row statistics (don't keep the f32 slab live across these) ---
    ax = jnp.abs(x_ref[...].astype(f32))
    mean_abs = jnp.mean(ax, axis=-1, keepdims=True)
    max_abs = jnp.max(ax, axis=-1, keepdims=True)
    scale = scale_factor * jnp.log1p(0.5 * (mean_abs + max_abs))
    # Exact reciprocal on the (row_tile, 1) vector; 1/temperature folded at
    # trace time.  Exactness here is essentially free (off the slab path).
    inv_scale = (1.0 / (scale + 1e-6)) * inv_temperature

    # --- full-slab transform: re-read the VMEM-resident block and scale ---
    x_scaled = x_ref[...].astype(f32) * inv_scale
    activated = jax.nn.sigmoid(x_scaled)

    # denom = sum(activated + eps) over vocab == sum(activated) + eps * vocab
    denom = jnp.sum(activated, axis=-1, keepdims=True) + eps * vocab
    probs = jnp.maximum(activated * (1.0 / denom), eps)
    # NOTE: upper clip to 1.0 dropped — with an exact denom reciprocal each
    # activated_i < denom, so probs_i is strictly below 1.0 (matches the
    # reference clamp exactly).

    total = jnp.sum(probs, axis=-1, keepdims=True)
    o_ref[...] = (probs * (1.0 / total)).astype(o_ref.dtype)


def _cdiv(a: int, b: int) -> int:
    return (a + b - 1) // b


def _tpu_vmem_capacity_bytes() -> int:
    try:
        return int(pltpu.get_tpu_info().vmem_capacity_bytes)
    except Exception:
        # Conservative default (v7x-sized per-TC VMEM).
        return 64 * 1024 * 1024


def _choose_tiling(rows: int, vocab: int, in_itemsize: int, out_itemsize: int):
    """Generation-aware, VMEM-budget-driven row tile (no artificial row cap)."""
    vmem_cap = _tpu_vmem_capacity_bytes()
    if vmem_cap >= 96 * 1024 * 1024:
        # v5e / v6e: 128 MiB VMEM per TensorCore — use it.
        pipeline_budget = 64 * 1024 * 1024
        vmem_limit = 100 * 1024 * 1024
        split_cores = False
    else:
        # v7x: 64 MiB VMEM per TC, 2 TCs per chip.
        pipeline_budget = 28 * 1024 * 1024
        vmem_limit = 48 * 1024 * 1024
        split_cores = True

    # dtype-aware sublane granule: 8 rows for 32-bit, 16 for bf16, 32 for 8-bit.
    sublane = max(8, 32 // max(1, min(in_itemsize, out_itemsize)))

    # Live bytes per row of tile: double-buffered input + double-buffered
    # output + ~one f32 intermediate slab (the stats pass doesn't keep the
    # f32 cast live).
    per_row_bytes = vocab * (2 * in_itemsize + 2 * out_itemsize + 4)
    vmem_rows = (pipeline_budget // per_row_bytes) // sublane * sublane
    row_tile = int(max(sublane, vmem_rows))  # no 1024-row cap

    rows_padded = _cdiv(rows, sublane) * sublane
    row_tile = min(row_tile, rows_padded)

    if split_cores and rows_padded >= 2 * sublane:
        # v7x: guarantee >= 2 grid steps so the "parallel" row axis shards
        # across both TensorCores.
        half = _cdiv(_cdiv(rows, 2), sublane) * sublane
        row_tile = min(row_tile, half)

    # TODO(synk): very large vocab (~200K+) in f32 can exceed the budget even
    # at the sublane-row floor on v7x; a two-pass (vocab-chunked) structure
    # with per-row partial stats in scratch would be needed there.
    return row_tile, vmem_limit


def improved_bounded_activation(
    x: jax.Array, temperature: float = 1.0, scale_factor: float = 1.0
) -> jax.Array:
    """Forward pass of ImprovedBoundedActivation.

    Args:
      x: logits of shape (..., vocab) — typically (batch, seq, vocab).
      temperature: scalar temperature (module default 1.0).
      scale_factor: scalar scale factor (module default 1.0).

    Returns:
      Normalized probabilities with the same shape and dtype as `x`.
    """
    orig_shape = x.shape
    vocab = orig_shape[-1]
    rows = 1
    for d in orig_shape[:-1]:
        rows *= d
    x2d = x.reshape(rows, vocab)  # no dtype cast here: stream native dtype

    out_dtype = x.dtype
    in_itemsize = jnp.dtype(x.dtype).itemsize
    out_itemsize = jnp.dtype(out_dtype).itemsize

    row_tile, vmem_limit = _choose_tiling(rows, vocab, in_itemsize, out_itemsize)
    grid = (_cdiv(rows, row_tile),)  # ragged rows: last block is padded

    # TODO(synk): for vocab << 128 a rows-on-lanes transposed layout would
    # avoid masked partial stores; not needed for vocab >= 128.
    kernel = functools.partial(
        _improved_bounded_kernel,
        inv_temperature=1.0 / float(temperature),
        scale_factor=float(scale_factor),
        vocab=float(vocab),
    )

    cost = pl.CostEstimate(
        flops=10 * rows * vocab,
        transcendentals=rows * vocab,
        bytes_accessed=rows * vocab * (in_itemsize + out_itemsize),
    )

    out2d = pl.pallas_call(
        kernel,
        out_shape=jax.ShapeDtypeStruct((rows, vocab), out_dtype),
        grid_spec=pltpu.PrefetchScalarGridSpec(
            num_scalar_prefetch=0,
            grid=grid,
            in_specs=[pl.BlockSpec((row_tile, vocab), lambda i: (i, 0))],
            out_specs=pl.BlockSpec((row_tile, vocab), lambda i: (i, 0)),
        ),
        compiler_params=pltpu.CompilerParams(
            dimension_semantics=("parallel",),
            vmem_limit_bytes=vmem_limit,
        ),
        cost_estimate=cost,
    )(x2d)

    return out2d.reshape(orig_shape)


def _reference_forward(x, temperature=1.0, scale_factor=1.0):
    x = x.astype(jnp.float32)
    ax = jnp.abs(x)
    mean_abs = jnp.mean(ax, axis=-1, keepdims=True)
    max_abs = jnp.max(ax, axis=-1, keepdims=True)
    scale = scale_factor * jnp.log1p(0.5 * (mean_abs + max_abs))
    x_scaled = x / (scale + 1e-6)
    activated = jax.nn.sigmoid(x_scaled / temperature)
    eps = 1e-7
    denom = jnp.sum(activated + eps, axis=-1, keepdims=True)
    probs = activated / denom
    probs = jnp.clip(probs, eps, 1.0)
    return probs / jnp.sum(probs, axis=-1, keepdims=True)


if __name__ == "__main__":
    key = jax.random.PRNGKey(0)
    batch, seq, vocab = 2, 8, 128  # vocab = 128 keeps loads/stores lane-dense
    x = jax.random.normal(key, (batch, seq, vocab), dtype=jnp.float32) * 3.0

    out = improved_bounded_activation(x, temperature=1.0, scale_factor=1.0)
    out = jax.block_until_ready(out)

    ref = _reference_forward(x, temperature=1.0, scale_factor=1.0)
    assert out.shape == (batch, seq, vocab)
    # Exact reciprocals now -> tight agreement with the reference.
    assert jnp.allclose(out.astype(jnp.float32), ref, rtol=2e-3, atol=1e-5), (
        "mismatch vs reference"
    )
    # Rows should sum to ~1.
    assert jnp.allclose(jnp.sum(out, axis=-1), 1.0, atol=1e-3)

    print("KERNEL_OK")
</pallas_src>

<mosaic_0001>
module attributes {stable_mosaic.version = 11 : i64} {
  func.func @_improved_bounded_kernel(%arg0: i32, %arg1: memref<8x128xf32, #tpu.memory_space<vmem>>, %arg2: memref<8x128xf32, #tpu.memory_space<vmem>>) attributes {dimension_semantics = [#tpu.dimension_semantics<parallel>], iteration_bounds = array<i64: 2>, scalar_prefetch = 0 : i64, scratch_operands = 0 : i64, tpu.core_type = #tpu.core_type<tc>, window_params = [{transform_indices = @transform_0, window_bounds = array<i64: 8, 128>}, {transform_indices = @transform_1, window_bounds = array<i64: 8, 128>}]} {
    %c0 = arith.constant 0 : index
    %c0_0 = arith.constant 0 : index
    %0 = vector.load %arg1[%c0, %c0_0] : memref<8x128xf32, #tpu.memory_space<vmem>>, vector<8x128xf32>
    %1 = math.absf %0 : vector<8x128xf32>
    %cst = arith.constant dense<0.000000e+00> : vector<8xf32>
    %2 = vector.multi_reduction <add>, %1, %cst [1] : vector<8x128xf32> to vector<8xf32>
    %3 = vector.shape_cast %2 : vector<8xf32> to vector<8x1xf32>
    %cst_1 = arith.constant 1.280000e+02 : f32
    %4 = vector.broadcast %cst_1 : f32 to vector<8x1xf32>
    %5 = arith.divf %3, %4 : vector<8x1xf32>
    %cst_2 = arith.constant dense<0xFF800000> : vector<8xf32>
    %6 = vector.multi_reduction <maximumf>, %1, %cst_2 [1] : vector<8x128xf32> to vector<8xf32>
    %7 = vector.shape_cast %6 : vector<8xf32> to vector<8x1xf32>
    %8 = arith.addf %5, %7 : vector<8x1xf32>
    %cst_3 = arith.constant 5.000000e-01 : f32
    %9 = vector.broadcast %cst_3 : f32 to vector<8x1xf32>
    %10 = arith.mulf %9, %8 : vector<8x1xf32>
    %11 = math.log1p %10 : vector<8x1xf32>
    %cst_4 = arith.constant 1.000000e+00 : f32
    %12 = vector.broadcast %cst_4 : f32 to vector<8x1xf32>
    %13 = arith.mulf %12, %11 : vector<8x1xf32>
    %cst_5 = arith.constant 9.99999997E-7 : f32
    %14 = vector.broadcast %cst_5 : f32 to vector<8x1xf32>
    %15 = arith.addf %13, %14 : vector<8x1xf32>
    %cst_6 = arith.constant 1.000000e+00 : f32
    %16 = vector.broadcast %cst_6 : f32 to vector<8x1xf32>
    %17 = arith.divf %16, %15 : vector<8x1xf32>
    %cst_7 = arith.constant 1.000000e+00 : f32
    %18 = vector.broadcast %cst_7 : f32 to vector<8x1xf32>
    %19 = arith.mulf %17, %18 : vector<8x1xf32>
    %c0_8 = arith.constant 0 : index
    %c0_9 = arith.constant 0 : index
    %20 = vector.load %arg1[%c0_8, %c0_9] : memref<8x128xf32, #tpu.memory_space<vmem>>, vector<8x128xf32>
    %21 = vector.broadcast %19 : vector<8x1xf32> to vector<8x128xf32>
    %22 = arith.mulf %20, %21 : vector<8x128xf32>
    %23 = arith.negf %22 : vector<8x128xf32>
    %24 = math.exp %23 : vector<8x128xf32>
    %cst_10 = arith.constant 1.000000e+00 : f32
    %25 = vector.broadcast %cst_10 : f32 to vector<8x128xf32>
    %26 = arith.addf %25, %24 : vector<8x128xf32>
    %27 = arith.divf %25, %26 : vector<8x128xf32>
    %cst_11 = arith.constant dense<0.000000e+00> : vector<8xf32>
    %28 = vector.multi_reduction <add>, %27, %cst_11 [1] : vector<8x128xf32> to vector<8xf32>
    %29 = vector.shape_cast %28 : vector<8xf32> to vector<8x1xf32>
    %cst_12 = arith.constant 1.280000e-05 : f32
    %30 = vector.broadcast %cst_12 : f32 to vector<8x1xf32>
    %31 = arith.addf %29, %30 : vector<8x1xf32>
    %cst_13 = arith.constant 1.000000e+00 : f32
    %32 = vector.broadcast %cst_13 : f32 to vector<8x1xf32>
    %33 = arith.divf %32, %31 : vector<8x1xf32>
    %34 = vector.broadcast %33 : vector<8x1xf32> to vector<8x128xf32>
    %35 = arith.mulf %27, %34 : vector<8x128xf32>
    %cst_14 = arith.constant 1.000000e-07 : f32
    %36 = vector.broadcast %cst_14 : f32 to vector<8x128xf32>
    %37 = arith.maximumf %35, %36 : vector<8x128xf32>
    %cst_15 = arith.constant dense<0.000000e+00> : vector<8xf32>
    %38 = vector.multi_reduction <add>, %37, %cst_15 [1] : vector<8x128xf32> to vector<8xf32>
    %39 = vector.shape_cast %38 : vector<8xf32> to vector<8x1xf32>
    %cst_16 = arith.constant 1.000000e+00 : f32
    %40 = vector.broadcast %cst_16 : f32 to vector<8x1xf32>
    %41 = arith.divf %40, %39 : vector<8x1xf32>
    %42 = vector.broadcast %41 : vector<8x1xf32> to vector<8x128xf32>
    %43 = arith.mulf %37, %42 : vector<8x128xf32>
    %c0_17 = arith.constant 0 : index
    %c0_18 = arith.constant 0 : index
    %44 = vector.load %arg2[%c0_17, %c0_18] : memref<8x128xf32, #tpu.memory_space<vmem>>, vector<8x128xf32>
    tpu.vector_store %arg2[%c0_17, %c0_18], %43 {strides = array<i32>} : memref<8x128xf32, #tpu.memory_space<vmem>>, vector<8x128xf32>,
    return
  }
  func.func @transform_0(%arg0: i32) -> (i32, i32) {
    %c0_i32 = arith.constant 0 : i32
    %c0_i32_0 = arith.constant 0 : i32
    return %arg0, %c0_i32 : i32, i32
  }
  func.func @transform_1(%arg0: i32) -> (i32, i32) {
    %c0_i32 = arith.constant 0 : i32
    %c0_i32_0 = arith.constant 0 : i32
    return %arg0, %c0_i32 : i32, i32
  }
}

</mosaic_0001>

<bundles_post_ra>
// kernel: tpu_custom_call.1
= control target key start
LH: loop header
LB: loop body
LE: loop exit
PB: predicated region body
PF: predicated region fallthrough
CT: control target
= control target key end

     0   :  { %6 = vsyncpa [#allocation3], 0  ;;  %s634_s0 = inlined_call_operand.hbm [shape: f32[16,128], index: 0, kind: input, shape index: {}]   ;;  %s635_s1 = inlined_call_operand.hbm [shape: f32[16,128], index: 1, kind: output, shape index: {}]  }
   0x1   :  { %8 = vsyncpa [#allocation3 + $0x1], 0 }
   0x2   :  { %9 = vsyncpa [#allocation4], 0 }
   0x3   :  { %11 = vsyncpa [#allocation4 + $0x1], 0  ;;  %s503_s6 = smov 0   ;;  %s505_s7 = smov 0  }
   0x4   :  { %s507_s8 = smov 0   ;;  %s509_s9 = smov 0  }
   0x5 LB: > { %s524_s10 = sadd.s32 4294967295, %s490_s9   ;;  %s320_s11 = sadd.s32 4294967294, %s490_s9   ;;  %s490_s9 = sphi %s509_s9, %s645_s9   ;;  %s486_s8 = sphi %s507_s8, %s644_s8   ;;  %s482_s7 = sphi %s505_s7, %s643_s7   ;;  %s478_s6 = sphi %s503_s6, %s642_s6  }
   0x6   : > { %s528_s12 = sadd.s32 1, %s490_s9   ;;  %s24_s13 = sadd.s32 1, %s486_s8 }
   0x7   : > { %s21_s14 = ssub.s32 %s490_s9, %s528_s12  ;;  %p31_p0 = scmp.ne.s32.totalorder %s486_s8, %s482_s7 }
   0x8   : > { %p22_p1 = scmp.eq.s32.totalorder %s21_s14, 0  ;;  %p32_p2 = scmp.eq.s32.totalorder %s490_s9, 0 }
   0x9   : > { %p37_p3 = scmp.ne.s32.totalorder %s482_s7, %s478_s6  ;;  %p38_p4 = scmp.eq.s32.totalorder %s524_s10, 0 }
   0xa   : > { %s540_s15 = scalar_select %p22_p1, %s486_s8, %s24_s13  }
   0xb   : > { %p542_p5 = por %p32_p2, %p31_p0  ;;  %p546_p6 = por %p38_p4, %p37_p3 }
   0xc   : > { %p61_p7 = scmp.eq.s32.totalorder %s524_s10, 1  ;;  %p67_p8 = scmp.eq.s32.totalorder %s320_s11, 1 }
   0xd   : > { %p345_p10 = scmp.lt.s32.totalorder %s490_s9, 2  ;;  %s87_s20 = sand.u32 1, %s486_s8  }
   0xe   : > { %p553_p11 = por %p61_p7, %p31_p0  ;;  %p557_p12 = por %p67_p8, %p37_p3 }
   0xf   : > { %s324_s21 = sshll.u32 %s490_s9, 3  ;;  %s323_s22 = sshll.u32 %s87_s20, 3 }
  0x10   : > { %s95_s25 = scalar_lea.hbm %s634_s0, %s324_s21  ;;  %s91_s27 = scalar_lea.vmem [#allocation2], %s323_s22 }
  0x11   : > { %s97_s26 = sshll.u32 %s95_s25, 4  ;;  %s99_s28 = sshll.u32 %s91_s27, 4  ;;  %s98_s26 = int_to_ptr.hbm [resolvable:$true] %s97_s26  ;;  %s100_s28 = int_to_ptr.vmem [resolvable:$true] %s99_s28 }
  0x12   : > { %p568_p13 = pnand %p345_p10, %p542_p5  ;;  %p325_p0 = scmp.ge.s32.totalorder %s490_s9, 1 }
  0x13   : > { %p104_p1 = scmp.lt.s32.totalorder %s490_s9, 3  ;;  %s88_s30 = scalar_lea.sflag [#allocation3], %s87_s20 }
  0x14   : > { %s394_s2 = sshra.s32 %s98_s26, 4  ;;  %p398_p3 = pneg %p568_p13  ;;  %s395_s2 = int_to_ptr.hbm [resolvable:$true] %s394_s2 }
  0x15   : > { %s396_s3 = scalar_lea.hbm %s395_s2, 8  ;;  %s401_s11 = scalar_lea.hbm %s634_s0, 16 }
  0x16   : > { %p397_p2 = scmp.ne.s32.totalorder %s395_s2, %s396_s3  ;;  %p402_p5 = scmp.lt.s32.totalorder %s395_s2, %s634_s0 }
  0x17   : > { %p403_p8 = scmp.lt.s32.totalorder %s401_s11, %s396_s3 }
  0x18   : > { %p399_p4 = pnand %p398_p3, %p397_p2 }
  0x19   : > { %p404_p10 = por %p403_p8, %p402_p5 }
  0x1a   : > { %p400_p7 = pneg %p399_p4 }
  0x1c   : > { %p405_p9 = pnand %p404_p10, %p400_p7 }
  0x1e   : > { %408 = shalt.err (!%p405_p9)
}
  0x1f   : > { %340 = dma.hbm_to_vmem [thread:$0]  (!%p568_p13), %s98_s26, 128, %s100_s28, %s88_s30  }
  0x20   : > { %p105_p2 = pnand %p325_p0, %p104_p1 }
  0x21   : > { %s589_s16 = sand.u32 (!%p105_p2), 1, %s482_s7  }
  0x22   : > { %108 = sbr.rel (%p105_p2) target bundleno = 509 (0x1fd), region = 24  ;;  %s326_s20 = sshll.u32 (!%p105_p2), %s589_s16, 3 }
  0x23   : > { %s111_s21 = scalar_lea.sflag (!%p105_p2), [#allocation3], %s589_s16  ;;  %s114_s22 = scalar_lea.vmem (!%p105_p2), [#allocation2], %s326_s20 }
  0x27   : > { %469 = dma.done.wait (%p546_p6), %s111_s21, 128  }
  0x28   : > { %471 = vsyncadd (%p546_p6), %s111_s21, 4294967168  ;;  %v134_v0 = vld [vmem:[%s114_s22] sm:$0xff]  ;;  %v492_v2 = vmov 128.0   ;;  %s330_s17 = sshll.u32 %s524_s10, 3  ;;  %s133_s26 = scalar_lea.vmem [#allocation5], %s326_s20 }
  0x29   : > { %v135_v1 = vand.u32 2147483647, %v134_v0  ;;  %380 = vrcp.f32 %v492_v2  ;;  %s245_s25 = scalar_lea.hbm %s635_s1, %s330_s17  ;;  %s247_s27 = sshll.u32 %s133_s26, 4  ;;  %s248_s27 = int_to_ptr.vmem [resolvable:$true] %s247_s27 }
  0x2a   : > { %s249_s28 = sshll.u32 %s245_s25, 4  ;;  %s235_s10 = scalar_lea.sflag [#allocation4], %s589_s16  ;;  %s250_s28 = int_to_ptr.hbm [resolvable:$true] %s249_s28 }
  0x2b   : > { %136 = vadd.xlane.f32.xlu0 %v135_v1  ;;  %s438_s29 = sshra.s32 %s250_s28, 4  ;;  %s444_s4 = scalar_lea.hbm %s635_s1, 16  ;;  %s439_s29 = int_to_ptr.hbm [resolvable:$true] %s438_s29 }
  0x2c   : > { %s440_s30 = scalar_lea.hbm %s439_s29, 8  ;;  %p445_p0 = scmp.lt.s32.totalorder %s439_s29, %s635_s1 }
  0x2d   : > { %p441_p6 = scmp.ne.s32.totalorder %s439_s29, %s440_s30  ;;  %p446_p1 = scmp.lt.s32.totalorder %s444_s4, %s440_s30 }
  0x2f   : > { %v381_v3 = vpop.eup %380  ;;  %p442_p9 = pnand %p441_p6, %p553_p11  ;;  %p447_p3 = por %p446_p1, %p445_p0 }
  0x30   : > { %v139_v4 = vmul.f32 128.0, %v381_v3  ;;  %vm143_vm0 = vweird.f32 %v381_v3 }
  0x31   : > { %p443_p13 = pneg %p442_p9 }
  0x32   : > { %v140_v5 = vsub.f32 1.0, %v139_v4 }
  0x33   : > { %146 = vmax.xlane.f32.xlu0 %v135_v1  ;;  %p448_p4 = pnand %p447_p3, %p443_p13 }
  0x34   : > { %v141_v6 = vmul.f32 %v381_v3, %v140_v5 }
  0x36   : > { %v142_v7 = vadd.f32 %v381_v3, %v141_v6 }
  0x38   : > { %v144_v9 = vsel %vm143_vm0, %v381_v3, %v142_v7 }
  0x9e   : > { %v137_v8 = vpop.xlane.xlu0 %136 }
  0x9f   : > { %v145_v10 = vmul.f32 %v144_v9, %v137_v8 }
  0xa6   : > { %v147_v11 = vpop.xlane.xlu0 %146 }
  0xa7   : > { %v148_v12 = vadd.f32 %v147_v11, %v145_v10 }
  0xa9   : > { %v149_v13 = vmul.f32 0.5, %v148_v12 }
  0xab   : > { %v150_v14 = vadd.f32 1.0, %v149_v13  ;;  %v153_v15 = vmul.f32 -0.5, %v149_v13  ;;  %v156_v17 = vand.u32 2147483647, %v149_v13 }
  0xad   : > { %382 = vlog2.f32 %v150_v14  ;;  %v154_v16 = vadd.f32 1.0, %v153_v15  ;;  %vm157_vm1 = vcmp.lt.f32.partialorder %v156_v17, 0.0004427343 }
  0xaf   : > { %v155_v20 = vmul.f32 %v154_v16, %v149_v13 }
  0xb3   : > { %v383_v18 = vpop.eup %382 }
  0xb4   : > { %v152_v19 = vmul.f32 0.6931472, %v383_v18 }
  0xb6   : > { %v158_v21 = vsel %vm157_vm1, %v155_v20, %v152_v19 }
  0xb7   : > { %v159_v22 = vadd.f32 1e-06, %v158_v21 }
  0xb9   : > { %384 = vrcp.f32 %v159_v22  ;;  %v171_v26 = vand.u32 2147483648, %v159_v22  ;;  %v169_v28 = vand.u32 2147483647, %v159_v22  ;;  %vm165_vm3 = vweird.f32 %v159_v22 }
  0xbb   : > { %v172_v30 = vor.u32 1.1754944e-38, %v171_v26  ;;  %vm170_vm5 = vcmp.eq.f32.partialorder %v169_v28, 8.507059e+37 }
  0xbf   : > { %v385_v23 = vpop.eup %384 }
  0xc0   : > { %v161_v24 = vmul.f32 %v385_v23, %v159_v22  ;;  %vm166_vm2 = vweird.f32 %v385_v23 }
  0xc1   : > { %vm167_vm4 = vmor %vm165_vm3, %vm166_vm2 }
  0xc2   : > { %v162_v25 = vsub.f32 1.0, %v161_v24 }
  0xc4   : > { %v163_v27 = vmul.f32 %v385_v23, %v162_v25 }
  0xc6   : > { %v164_v29 = vadd.f32 %v385_v23, %v163_v27 }
  0xc8   : > { %v168_v31 = vsel %vm167_vm4, %v385_v23, %v164_v29 }
  0xc9   : > { %v173_v32 = vsel %vm170_vm5, %v172_v30, %v168_v31 }
  0xca   : > { %v175_v33 = vmul.f32 %v173_v32, %v134_v0 }
  0xcc   : > { %v328_v34 = vmul.f32 -1.442695, %v175_v33 }
  0xce   : > { %386 = vpow2.f32 %v328_v34 }
  0xd4   : > { %v387_v35 = vpop.eup %386 }
  0xd5   : > { %v179_v36 = vadd.f32 1.0, %v387_v35 }
  0xd7   : > { %388 = vrcp.f32 %v179_v36  ;;  %v191_v40 = vand.u32 2147483648, %v179_v36  ;;  %v189_v42 = vand.u32 2147483647, %v179_v36  ;;  %vm185_vm7 = vweird.f32 %v179_v36 }
  0xd9   : > { %v192_v44 = vor.u32 1.1754944e-38, %v191_v40  ;;  %vm190_vm9 = vcmp.eq.f32.partialorder %v189_v42, 8.507059e+37 }
  0xdd   : > { %v389_v37 = vpop.eup %388 }
  0xde   : > { %v181_v38 = vmul.f32 %v389_v37, %v179_v36  ;;  %vm186_vm6 = vweird.f32 %v389_v37 }
  0xdf   : > { %vm187_vm8 = vmor %vm185_vm7, %vm186_vm6 }
  0xe0   : > { %v182_v39 = vsub.f32 1.0, %v181_v38 }
  0xe2   : > { %v183_v41 = vmul.f32 %v389_v37, %v182_v39 }
  0xe4   : > { %v184_v43 = vadd.f32 %v389_v37, %v183_v41 }
  0xe6   : > { %v188_v45 = vsel %vm187_vm8, %v389_v37, %v184_v43 }
  0xe7   : > { %v193_v46 = vsel %vm190_vm9, %v192_v44, %v188_v45 }
  0xe8   : > { %195 = vadd.xlane.f32.xlu1 %v193_v46 }
 0x15b   : > { %v196_v47 = vpop.xlane.xlu1 %195 }
 0x15c   : > { %v197_v48 = vadd.f32 1.28e-05, %v196_v47 }
 0x15e   : > { %390 = vrcp.f32 %v197_v48  ;;  %v209_v52 = vand.u32 2147483648, %v197_v48  ;;  %v207_v54 = vand.u32 2147483647, %v197_v48  ;;  %vm203_vm11 = vweird.f32 %v197_v48 }
 0x160   : > { %v210_v56 = vor.u32 1.1754944e-38, %v209_v52  ;;  %vm208_vm13 = vcmp.eq.f32.partialorder %v207_v54, 8.507059e+37 }
 0x164   : > { %v391_v49 = vpop.eup %390 }
 0x165   : > { %v199_v50 = vmul.f32 %v391_v49, %v197_v48  ;;  %vm204_vm10 = vweird.f32 %v391_v49 }
 0x166   : > { %vm205_vm12 = vmor %vm203_vm11, %vm204_vm10 }
 0x167   : > { %v200_v51 = vsub.f32 1.0, %v199_v50 }
 0x169   : > { %v201_v53 = vmul.f32 %v391_v49, %v200_v51 }
 0x16b   : > { %v202_v55 = vadd.f32 %v391_v49, %v201_v53 }
 0x16d   : > { %v206_v57 = vsel %vm205_vm12, %v391_v49, %v202_v55 }
 0x16e   : > { %v211_v58 = vsel %vm208_vm13, %v210_v56, %v206_v57 }
 0x16f   : > { %v213_v59 = vmul.f32 %v211_v58, %v193_v46 }
 0x171   : > { %v214_v60 = vmax.f32 %v213_v59, 1e-07 }
 0x173   : > { %215 = vadd.xlane.f32.xlu1 %v214_v60 }
 0x1e6   : > { %v216_v61 = vpop.xlane.xlu1 %215 }
 0x1e7   : > { %392 = vrcp.f32 %v216_v61  ;;  %v228_v1 = vand.u32 2147483648, %v216_v61  ;;  %v226_v3 = vand.u32 2147483647, %v216_v61  ;;  %vm222_vm15 = vweird.f32 %v216_v61 }
 0x1e9   : > { %v229_v5 = vor.u32 1.1754944e-38, %v228_v1  ;;  %vm227_vm1 = vcmp.eq.f32.partialorder %v226_v3, 8.507059e+37 }
 0x1ed   : > { %v393_v62 = vpop.eup %392 }
 0x1ee   : > { %v218_v63 = vmul.f32 %v393_v62, %v216_v61  ;;  %vm223_vm14 = vweird.f32 %v393_v62 }
 0x1ef   : > { %vm224_vm0 = vmor %vm222_vm15, %vm223_vm14 }
 0x1f0   : > { %v219_v0 = vsub.f32 1.0, %v218_v63 }
 0x1f2   : > { %v220_v2 = vmul.f32 %v393_v62, %v219_v0 }
 0x1f4   : > { %v221_v4 = vadd.f32 %v393_v62, %v220_v2 }
 0x1f6   : > { %v225_v6 = vsel %vm224_vm0, %v393_v62, %v221_v4 }
 0x1f7   : > { %v230_v7 = vsel %vm227_vm1, %v229_v5, %v225_v6 }
 0x1f8   : > { %v232_v8 = vmul.f32 %v230_v7, %v214_v60 }
 0x1fa   : > { %233 = vst [vmem:[%s133_s26] sm:$0xff] %v232_v8 }
 0x1fb   : > { %451 = shalt.err (!%p448_p4)
}
 0x1fc   : > { %335 = dma.vmem_to_hbm [thread:$0]  (%p553_p11), %s248_s27, 128, %s250_s28, %s235_s10  }
 0x1fd PF: > { %s261_s13 = sand.u32 1, %s478_s6   ;;  %p641_p7 = scmp.ge.s32.totalorder %s490_s9, 2 }
 0x1fe   : > { %s262_s14 = scalar_lea.sflag [#allocation4], %s261_s13 }
 0x1ff   : > { %p342_p5 = pnand %p641_p7, %p557_p12 }
 0x201   : > { %p343_p8 = pneg %p342_p5 }
 0x203   : > { %473 = dma.done.wait (%p343_p8), %s262_s14, 128  }
 0x204   : > { %475 = vsyncadd (%p343_p8), %s262_s14, 4294967168  ;;  %p14_p10 = scmp.ge.s32.totalorder %s528_s12, 4   ;;  %s642_s6 = smov %s482_s7 }
 0x205   : > { %s643_s7 = smov %s486_s8  ;;  %s644_s8 = smov %s540_s15 }
 0x206   : > { %s645_s9 = smov %s528_s12  ;;  %16 = sbr.rel (!%p14_p10) target bundleno = 5 (0x5), region = 69 }
 0x20b   :  { %268 = vsyncpa [#allocation3], 1 }
 0x20c   :  { %270 = vsyncpa [#allocation3 + $0x1], 1 }
 0x20d   :  { %271 = vsyncpa [#allocation4], 1 }
 0x20e   :  { %273 = vsyncpa [#allocation4 + $0x1], 1 }

</bundles_post_ra>
